<compile_context>
chip_gen: v6e
topology: v6e:2x2x1
jax: 0.10.0
libtpu: 0.0.40
codegen_flags: <defaults>
</compile_context>

<pallas_src>
import math

import jax
import jax.numpy as jnp
from jax.experimental import pallas as pl
from jax.experimental.pallas import tpu as pltpu

# ----------------------------- config (arg.*) -----------------------------
HIDDEN = 32          # arg.hidden_layer_state
HEAD_NUM = 4         # arg.head_num
HEAD_DIM = HIDDEN // HEAD_NUM
LN_EPS = 1e-5        # nn.LayerNorm default
NEG_FILL = -1000000000.0


def _mha_kernel(x_ref, mask_ref, wqkv_ref, bqkv_ref, gamma_ref, beta_ref, o_ref):
    # x_ref:    (rows, D)   flattened (batch*seq, hidden) slab
    # mask_ref: (Bblk, S, S) f32, nonzero == masked
    rows, D = x_ref.shape
    bblk, S, _ = mask_ref.shape

    x2 = x_ref[...]                                              # (rows, D) f32

    # ---- fused Q/K/V projection: one MXU matmul instead of three ----
    # (Q weights/bias already carry the 1/sqrt(HIDDEN) scale, folded in the wrapper.)
    qkv = jnp.dot(x2, wqkv_ref[...],
                  preferred_element_type=jnp.float32) + bqkv_ref[...]   # (rows, 3D)

    # masked_fill predicate, head-invariant -> computed once per grid step
    masked = mask_ref[...] != 0.0                                # (bblk, S, S) bool

    # ---- per-head attention, batched over the batch axis (3-D einsums) ----
    head_outs = []
    for h in range(HEAD_NUM):
        c0 = h * HEAD_DIM
        qh = qkv[:, c0:c0 + HEAD_DIM].reshape(bblk, S, HEAD_DIM)
        kh = qkv[:, D + c0:D + c0 + HEAD_DIM].reshape(bblk, S, HEAD_DIM)
        vh = qkv[:, 2 * D + c0:2 * D + c0 + HEAD_DIM].reshape(bblk, S, HEAD_DIM)

        w = jnp.einsum('bqd,bkd->bqk', qh, kh,
                       preferred_element_type=jnp.float32)       # (bblk, S, S)
        w = jnp.where(masked, NEG_FILL, w)                       # exact masked_fill

        # numerically stable softmax; normalization deferred past P@V
        w_max = jnp.max(w, axis=-1, keepdims=True)
        e = jnp.exp(w - w_max)
        denom = jnp.sum(e, axis=-1, keepdims=True)               # (bblk, S, 1)

        oh = jnp.einsum('bqk,bkd->bqd', e, vh,
                        preferred_element_type=jnp.float32)      # (bblk, S, dh)
        oh = oh * pl.reciprocal(denom, approx=False)             # exact, off MXU path
        head_outs.append(oh.reshape(rows, HEAD_DIM))

    # single lane-concat of head outputs (no VMEM scratch round-trip)
    attn = jnp.concatenate(head_outs, axis=-1)                   # (rows, D)

    # ---- residual + LayerNorm over the whole (rows, D) slab ----
    y = x2 + attn
    mean = jnp.mean(y, axis=-1, keepdims=True)
    var = jnp.mean((y - mean) ** 2, axis=-1, keepdims=True)
    normed = (y - mean) * jax.lax.rsqrt(var + LN_EPS)
    o_ref[...] = (normed * gamma_ref[...] + beta_ref[...]).astype(o_ref.dtype)


@jax.jit
def multi_head_attention(x, mask_f, pad_mask, packed):
    """x: (B, S, D) f32; mask_f: (B, 1, S, S) f32 (nonzero = masked); pad_mask unused.

    `packed` holds fused params: wqkv (D, 3D), bqkv (1, 3D), gamma/beta (1, D).
    """
    # TODO(synk): pad_mask is unused in the original PyTorch forward; kept for API parity.
    del pad_mask
    B, S, D = x.shape
    rows = B * S

    # Wrapper-side (free) reshapes: 2-D activation slab + mask without its size-1 axis.
    x2 = x.reshape(rows, D)
    mask3 = mask_f.reshape(B, S, S)

    # Megacore split only when each core gets enough rows to cover MXU fill/drain
    # and per-step overhead; at B=2, S=8 this collapses to a single grid step.
    grid_b = 2 if (B % 2 == 0 and (rows // 2) >= 256) else 1
    bblk = B // grid_b
    rblk = rows // grid_b

    grid_spec = pltpu.PrefetchScalarGridSpec(
        num_scalar_prefetch=0,
        grid=(grid_b,),
        in_specs=[
            pl.BlockSpec((rblk, D), lambda i: (i, 0)),            # x slab
            pl.BlockSpec((bblk, S, S), lambda i: (i, 0, 0)),      # mask
            pl.BlockSpec((D, 3 * D), lambda i: (0, 0)),           # wqkv (fused)
            pl.BlockSpec((1, 3 * D), lambda i: (0, 0)),           # bqkv (fused)
            pl.BlockSpec((1, D), lambda i: (0, 0)),               # gamma
            pl.BlockSpec((1, D), lambda i: (0, 0)),               # beta
        ],
        out_specs=pl.BlockSpec((rblk, D), lambda i: (i, 0)),
    )

    out2 = pl.pallas_call(
        _mha_kernel,
        out_shape=jax.ShapeDtypeStruct((rows, D), x.dtype),
        grid_spec=grid_spec,
        compiler_params=pltpu.CompilerParams(
            dimension_semantics=("parallel",)),
    )(x2, mask3, packed["wqkv"], packed["bqkv"], packed["gamma"], packed["beta"])

    return out2.reshape(B, S, D)


def init_params(key, hidden):
    """Deterministic parameter init mirroring nn.Linear / nn.LayerNorm shapes."""
    ks = jax.random.split(key, 6)
    bound = 1.0 / math.sqrt(hidden)
    # torch Linear weight is (out, in); we store the transpose (in, out).
    wq = jax.random.uniform(ks[0], (hidden, hidden), jnp.float32, -bound, bound)
    wk = jax.random.uniform(ks[1], (hidden, hidden), jnp.float32, -bound, bound)
    wv = jax.random.uniform(ks[2], (hidden, hidden), jnp.float32, -bound, bound)
    bq = jax.random.uniform(ks[3], (1, hidden), jnp.float32, -bound, bound)
    bk = jax.random.uniform(ks[4], (1, hidden), jnp.float32, -bound, bound)
    bv = jax.random.uniform(ks[5], (1, hidden), jnp.float32, -bound, bound)
    gamma = jnp.ones((1, hidden), jnp.float32)   # LayerNorm weight init
    beta = jnp.zeros((1, hidden), jnp.float32)   # LayerNorm bias init
    return dict(wq=wq, wk=wk, wv=wv, bq=bq, bk=bk, bv=bv, gamma=gamma, beta=beta)


def pack_params(params):
    """Fuse Q/K/V weights/biases and pre-fold the 1/sqrt(HIDDEN) scale into Q."""
    inv_scale = 1.0 / math.sqrt(HIDDEN)   # matches torch.sqrt(hidden_layer_state)
    wqkv = jnp.concatenate(
        [params["wq"] * inv_scale, params["wk"], params["wv"]], axis=1)   # (D, 3D)
    bqkv = jnp.concatenate(
        [params["bq"] * inv_scale, params["bk"], params["bv"]], axis=1)   # (1, 3D)
    return dict(wqkv=wqkv, bqkv=bqkv, gamma=params["gamma"], beta=params["beta"])


def _reference(x, mask_f, p):
    """Pure-JAX reference with the exact PyTorch-module math (unfused weights)."""
    B, S, D = x.shape
    q = x @ p["wq"] + p["bq"][0]
    k = x @ p["wk"] + p["bk"][0]
    v = x @ p["wv"] + p["bv"][0]

    def split(t):
        return t.reshape(B, S, HEAD_NUM, HEAD_DIM).transpose(0, 2, 1, 3)

    qh, kh, vh = split(q), split(k), split(v)
    w = jnp.einsum("bhqd,bhkd->bhqk", qh, kh) / jnp.sqrt(jnp.float32(D))
    w = jnp.where(mask_f > 0.0, NEG_FILL, w)          # masked_fill_
    pmat = jax.nn.softmax(w, axis=-1)
    a = jnp.einsum("bhqk,bhkd->bhqd", pmat, vh)
    a = a.transpose(0, 2, 1, 3).reshape(B, S, D)
    y = x + a
    mu = y.mean(-1, keepdims=True)
    var = ((y - mu) ** 2).mean(-1, keepdims=True)
    return (y - mu) / jnp.sqrt(var + LN_EPS) * p["gamma"][0] + p["beta"][0]


if __name__ == "__main__":
    B, S, D = 2, 8, HIDDEN

    key = jax.random.PRNGKey(0)
    k_x, k_p = jax.random.split(key)
    x = jax.random.normal(k_x, (B, S, D), jnp.float32)

    # Causal mask: True (==1.0) above the diagonal -> filled with -1e9.
    row = jnp.arange(S)[:, None]
    col = jnp.arange(S)[None, :]
    mask_f = jnp.broadcast_to((col > row).astype(jnp.float32), (B, 1, S, S))
    pad_mask = jnp.zeros((B, 1, 1, S), jnp.float32)  # unused, API parity only

    params = init_params(k_p, D)
    packed = pack_params(params)     # done once, outside the jitted kernel call

    out = multi_head_attention(x, mask_f, pad_mask, packed)
    jax.block_until_ready(out)

    expected = _reference(x, mask_f, params)
    assert out.shape == (B, S, D)
    assert jnp.allclose(out, expected, atol=1e-5, rtol=1e-5), "mismatch vs reference"

    print("KERNEL_OK")
</pallas_src>

<mosaic_0001>
module attributes {stable_mosaic.version = 11 : i64} {
  func.func @_mha_kernel(%arg0: i32, %arg1: memref<16x32xf32, #tpu.memory_space<vmem>>, %arg2: memref<2x8x8xf32, #tpu.memory_space<vmem>>, %arg3: memref<32x96xf32, #tpu.memory_space<vmem>>, %arg4: memref<1x96xf32, #tpu.memory_space<vmem>>, %arg5: memref<1x32xf32, #tpu.memory_space<vmem>>, %arg6: memref<1x32xf32, #tpu.memory_space<vmem>>, %arg7: memref<16x32xf32, #tpu.memory_space<vmem>>) attributes {dimension_semantics = [#tpu.dimension_semantics<parallel>], iteration_bounds = array<i64: 1>, scalar_prefetch = 0 : i64, scratch_operands = 0 : i64, tpu.core_type = #tpu.core_type<tc>, window_params = [{transform_indices = @transform_0, window_bounds = array<i64: 16, 32>}, {transform_indices = @transform_1, window_bounds = array<i64: 2, 8, 8>}, {pipeline_mode = #tpu.pipeline_mode<synchronous>, transform_indices = @transform_2, window_bounds = array<i64: 32, 96>}, {pipeline_mode = #tpu.pipeline_mode<synchronous>, transform_indices = @transform_3, window_bounds = array<i64: 1, 96>}, {pipeline_mode = #tpu.pipeline_mode<synchronous>, transform_indices = @transform_4, window_bounds = array<i64: 1, 32>}, {pipeline_mode = #tpu.pipeline_mode<synchronous>, transform_indices = @transform_5, window_bounds = array<i64: 1, 32>}, {transform_indices = @transform_6, window_bounds = array<i64: 16, 32>}]} {
    %c0 = arith.constant 0 : index
    %c0_0 = arith.constant 0 : index
    %0 = vector.load %arg1[%c0, %c0_0] : memref<16x32xf32, #tpu.memory_space<vmem>>, vector<16x32xf32>
    %c0_1 = arith.constant 0 : index
    %c0_2 = arith.constant 0 : index
    %1 = vector.load %arg3[%c0_1, %c0_2] : memref<32x96xf32, #tpu.memory_space<vmem>>, vector<32x96xf32>
    %cst = arith.constant dense<0.000000e+00> : vector<16x96xf32>
    %2 = tpu.matmul %0, %1, %cst {dimension_numbers = #tpu.dot_dimension_numbers<[1], [0], [0], [1], [0, 0, 1, 1], [], []>} : vector<16x32xf32>, vector<32x96xf32>, vector<16x96xf32> -> vector<16x96xf32>
    %c0_3 = arith.constant 0 : index
    %c0_4 = arith.constant 0 : index
    %3 = vector.load %arg4[%c0_3, %c0_4] : memref<1x96xf32, #tpu.memory_space<vmem>>, vector<1x96xf32>
    %4 = vector.broadcast %3 : vector<1x96xf32> to vector<16x96xf32>
    %5 = arith.addf %2, %4 : vector<16x96xf32>
    %c0_5 = arith.constant 0 : index
    %c0_6 = arith.constant 0 : index
    %c0_7 = arith.constant 0 : index
    %6 = vector.load %arg2[%c0_5, %c0_6, %c0_7] : memref<2x8x8xf32, #tpu.memory_space<vmem>>, vector<2x8x8xf32>
    %cst_8 = arith.constant 0.000000e+00 : f32
    %7 = vector.broadcast %cst_8 : f32 to vector<2x8x8xf32>
    %8 = arith.cmpf one, %6, %7 : vector<2x8x8xf32>
    %9 = vector.extract_strided_slice %5 {offsets = [0, 0], sizes = [16, 8], strides = [1, 1]} : vector<16x96xf32> to vector<16x8xf32>
    %10 = vector.shape_cast %9 : vector<16x8xf32> to vector<2x8x8xf32>
    %11 = vector.extract_strided_slice %5 {offsets = [0, 32], sizes = [16, 8], strides = [1, 1]} : vector<16x96xf32> to vector<16x8xf32>
    %12 = vector.shape_cast %11 : vector<16x8xf32> to vector<2x8x8xf32>
    %13 = vector.extract_strided_slice %5 {offsets = [0, 64], sizes = [16, 8], strides = [1, 1]} : vector<16x96xf32> to vector<16x8xf32>
    %14 = vector.shape_cast %13 : vector<16x8xf32> to vector<2x8x8xf32>
    "tpu.trace_start"() <{level = 10 : i32, message = "bqd,bkd->bqk"}> : () -> ()
    %cst_9 = arith.constant dense<0.000000e+00> : vector<2x8x8xf32>
    %15 = tpu.matmul %10, %12, %cst_9 {dimension_numbers = #tpu.dot_dimension_numbers<[2], [2], [1], [1], [0, 0, 0, 1, 1, 1], [0], [0]>} : vector<2x8x8xf32>, vector<2x8x8xf32>, vector<2x8x8xf32> -> vector<2x8x8xf32>
    %cst_10 = arith.constant -1.000000e+09 : f32
    "tpu.trace_stop"() : () -> ()
    %16 = vector.broadcast %cst_10 : f32 to vector<2x8x8xf32>
    %17 = arith.select %8, %16, %15 : vector<2x8x8xi1>, vector<2x8x8xf32>
    %cst_11 = arith.constant dense<0xFF800000> : vector<2x8xf32>
    %18 = vector.multi_reduction <maximumf>, %17, %cst_11 [2] : vector<2x8x8xf32> to vector<2x8xf32>
    %19 = vector.shape_cast %18 : vector<2x8xf32> to vector<2x8x1xf32>
    %20 = vector.broadcast %19 : vector<2x8x1xf32> to vector<2x8x8xf32>
    %21 = arith.subf %17, %20 : vector<2x8x8xf32>
    %22 = math.exp %21 : vector<2x8x8xf32>
    %cst_12 = arith.constant dense<0.000000e+00> : vector<2x8xf32>
    %23 = vector.multi_reduction <add>, %22, %cst_12 [2] : vector<2x8x8xf32> to vector<2x8xf32>
    %24 = vector.shape_cast %23 : vector<2x8xf32> to vector<2x8x1xf32>
    "tpu.trace_start"() <{level = 10 : i32, message = "bqk,bkd->bqd"}> : () -> ()
    %cst_13 = arith.constant dense<0.000000e+00> : vector<2x8x8xf32>
    %25 = tpu.matmul %22, %14, %cst_13 {dimension_numbers = #tpu.dot_dimension_numbers<[2], [1], [1], [2], [0, 0, 0, 1, 1, 2], [0], [0]>} : vector<2x8x8xf32>, vector<2x8x8xf32>, vector<2x8x8xf32> -> vector<2x8x8xf32>
    "tpu.trace_stop"() : () -> ()
    %26 = tpu.reciprocal %24 : vector<2x8x1xf32> -> vector<2x8x1xf32>
    %27 = vector.broadcast %26 : vector<2x8x1xf32> to vector<2x8x8xf32>
    %28 = arith.mulf %25, %27 : vector<2x8x8xf32>
    %29 = vector.shape_cast %28 : vector<2x8x8xf32> to vector<16x8xf32>
    %30 = vector.extract_strided_slice %5 {offsets = [0, 8], sizes = [16, 8], strides = [1, 1]} : vector<16x96xf32> to vector<16x8xf32>
    %31 = vector.shape_cast %30 : vector<16x8xf32> to vector<2x8x8xf32>
    %32 = vector.extract_strided_slice %5 {offsets = [0, 40], sizes = [16, 8], strides = [1, 1]} : vector<16x96xf32> to vector<16x8xf32>
    %33 = vector.shape_cast %32 : vector<16x8xf32> to vector<2x8x8xf32>
    %34 = vector.extract_strided_slice %5 {offsets = [0, 72], sizes = [16, 8], strides = [1, 1]} : vector<16x96xf32> to vector<16x8xf32>
    %35 = vector.shape_cast %34 : vector<16x8xf32> to vector<2x8x8xf32>
    "tpu.trace_start"() <{level = 10 : i32, message = "bqd,bkd->bqk"}> : () -> ()
    %cst_14 = arith.constant dense<0.000000e+00> : vector<2x8x8xf32>
    %36 = tpu.matmul %31, %33, %cst_14 {dimension_numbers = #tpu.dot_dimension_numbers<[2], [2], [1], [1], [0, 0, 0, 1, 1, 1], [0], [0]>} : vector<2x8x8xf32>, vector<2x8x8xf32>, vector<2x8x8xf32> -> vector<2x8x8xf32>
    %cst_15 = arith.constant -1.000000e+09 : f32
    "tpu.trace_stop"() : () -> ()
    %37 = vector.broadcast %cst_15 : f32 to vector<2x8x8xf32>
    %38 = arith.select %8, %37, %36 : vector<2x8x8xi1>, vector<2x8x8xf32>
    %cst_16 = arith.constant dense<0xFF800000> : vector<2x8xf32>
    %39 = vector.multi_reduction <maximumf>, %38, %cst_16 [2] : vector<2x8x8xf32> to vector<2x8xf32>
    %40 = vector.shape_cast %39 : vector<2x8xf32> to vector<2x8x1xf32>
    %41 = vector.broadcast %40 : vector<2x8x1xf32> to vector<2x8x8xf32>
    %42 = arith.subf %38, %41 : vector<2x8x8xf32>
    %43 = math.exp %42 : vector<2x8x8xf32>
    %cst_17 = arith.constant dense<0.000000e+00> : vector<2x8xf32>
    %44 = vector.multi_reduction <add>, %43, %cst_17 [2] : vector<2x8x8xf32> to vector<2x8xf32>
    %45 = vector.shape_cast %44 : vector<2x8xf32> to vector<2x8x1xf32>
    "tpu.trace_start"() <{level = 10 : i32, message = "bqk,bkd->bqd"}> : () -> ()
    %cst_18 = arith.constant dense<0.000000e+00> : vector<2x8x8xf32>
    %46 = tpu.matmul %43, %35, %cst_18 {dimension_numbers = #tpu.dot_dimension_numbers<[2], [1], [1], [2], [0, 0, 0, 1, 1, 2], [0], [0]>} : vector<2x8x8xf32>, vector<2x8x8xf32>, vector<2x8x8xf32> -> vector<2x8x8xf32>
    "tpu.trace_stop"() : () -> ()
    %47 = tpu.reciprocal %45 : vector<2x8x1xf32> -> vector<2x8x1xf32>
    %48 = vector.broadcast %47 : vector<2x8x1xf32> to vector<2x8x8xf32>
    %49 = arith.mulf %46, %48 : vector<2x8x8xf32>
    %50 = vector.shape_cast %49 : vector<2x8x8xf32> to vector<16x8xf32>
    %51 = vector.extract_strided_slice %5 {offsets = [0, 16], sizes = [16, 8], strides = [1, 1]} : vector<16x96xf32> to vector<16x8xf32>
    %52 = vector.shape_cast %51 : vector<16x8xf32> to vector<2x8x8xf32>
    %53 = vector.extract_strided_slice %5 {offsets = [0, 48], sizes = [16, 8], strides = [1, 1]} : vector<16x96xf32> to vector<16x8xf32>
    %54 = vector.shape_cast %53 : vector<16x8xf32> to vector<2x8x8xf32>
    %55 = vector.extract_strided_slice %5 {offsets = [0, 80], sizes = [16, 8], strides = [1, 1]} : vector<16x96xf32> to vector<16x8xf32>
    %56 = vector.shape_cast %55 : vector<16x8xf32> to vector<2x8x8xf32>
    "tpu.trace_start"() <{level = 10 : i32, message = "bqd,bkd->bqk"}> : () -> ()
    %cst_19 = arith.constant dense<0.000000e+00> : vector<2x8x8xf32>
    %57 = tpu.matmul %52, %54, %cst_19 {dimension_numbers = #tpu.dot_dimension_numbers<[2], [2], [1], [1], [0, 0, 0, 1, 1, 1], [0], [0]>} : vector<2x8x8xf32>, vector<2x8x8xf32>, vector<2x8x8xf32> -> vector<2x8x8xf32>
    %cst_20 = arith.constant -1.000000e+09 : f32
    "tpu.trace_stop"() : () -> ()
    %58 = vector.broadcast %cst_20 : f32 to vector<2x8x8xf32>
    %59 = arith.select %8, %58, %57 : vector<2x8x8xi1>, vector<2x8x8xf32>
    %cst_21 = arith.constant dense<0xFF800000> : vector<2x8xf32>
    %60 = vector.multi_reduction <maximumf>, %59, %cst_21 [2] : vector<2x8x8xf32> to vector<2x8xf32>
    %61 = vector.shape_cast %60 : vector<2x8xf32> to vector<2x8x1xf32>
    %62 = vector.broadcast %61 : vector<2x8x1xf32> to vector<2x8x8xf32>
    %63 = arith.subf %59, %62 : vector<2x8x8xf32>
    %64 = math.exp %63 : vector<2x8x8xf32>
    %cst_22 = arith.constant dense<0.000000e+00> : vector<2x8xf32>
    %65 = vector.multi_reduction <add>, %64, %cst_22 [2] : vector<2x8x8xf32> to vector<2x8xf32>
    %66 = vector.shape_cast %65 : vector<2x8xf32> to vector<2x8x1xf32>
    "tpu.trace_start"() <{level = 10 : i32, message = "bqk,bkd->bqd"}> : () -> ()
    %cst_23 = arith.constant dense<0.000000e+00> : vector<2x8x8xf32>
    %67 = tpu.matmul %64, %56, %cst_23 {dimension_numbers = #tpu.dot_dimension_numbers<[2], [1], [1], [2], [0, 0, 0, 1, 1, 2], [0], [0]>} : vector<2x8x8xf32>, vector<2x8x8xf32>, vector<2x8x8xf32> -> vector<2x8x8xf32>
    "tpu.trace_stop"() : () -> ()
    %68 = tpu.reciprocal %66 : vector<2x8x1xf32> -> vector<2x8x1xf32>
    %69 = vector.broadcast %68 : vector<2x8x1xf32> to vector<2x8x8xf32>
    %70 = arith.mulf %67, %69 : vector<2x8x8xf32>
    %71 = vector.shape_cast %70 : vector<2x8x8xf32> to vector<16x8xf32>
    %72 = vector.extract_strided_slice %5 {offsets = [0, 24], sizes = [16, 8], strides = [1, 1]} : vector<16x96xf32> to vector<16x8xf32>
    %73 = vector.shape_cast %72 : vector<16x8xf32> to vector<2x8x8xf32>
    %74 = vector.extract_strided_slice %5 {offsets = [0, 56], sizes = [16, 8], strides = [1, 1]} : vector<16x96xf32> to vector<16x8xf32>
    %75 = vector.shape_cast %74 : vector<16x8xf32> to vector<2x8x8xf32>
    %76 = vector.extract_strided_slice %5 {offsets = [0, 88], sizes = [16, 8], strides = [1, 1]} : vector<16x96xf32> to vector<16x8xf32>
    %77 = vector.shape_cast %76 : vector<16x8xf32> to vector<2x8x8xf32>
    "tpu.trace_start"() <{level = 10 : i32, message = "bqd,bkd->bqk"}> : () -> ()
    %cst_24 = arith.constant dense<0.000000e+00> : vector<2x8x8xf32>
    %78 = tpu.matmul %73, %75, %cst_24 {dimension_numbers = #tpu.dot_dimension_numbers<[2], [2], [1], [1], [0, 0, 0, 1, 1, 1], [0], [0]>} : vector<2x8x8xf32>, vector<2x8x8xf32>, vector<2x8x8xf32> -> vector<2x8x8xf32>
    %cst_25 = arith.constant -1.000000e+09 : f32
    "tpu.trace_stop"() : () -> ()
    %79 = vector.broadcast %cst_25 : f32 to vector<2x8x8xf32>
    %80 = arith.select %8, %79, %78 : vector<2x8x8xi1>, vector<2x8x8xf32>
    %cst_26 = arith.constant dense<0xFF800000> : vector<2x8xf32>
    %81 = vector.multi_reduction <maximumf>, %80, %cst_26 [2] : vector<2x8x8xf32> to vector<2x8xf32>
    %82 = vector.shape_cast %81 : vector<2x8xf32> to vector<2x8x1xf32>
    %83 = vector.broadcast %82 : vector<2x8x1xf32> to vector<2x8x8xf32>
    %84 = arith.subf %80, %83 : vector<2x8x8xf32>
    %85 = math.exp %84 : vector<2x8x8xf32>
    %cst_27 = arith.constant dense<0.000000e+00> : vector<2x8xf32>
    %86 = vector.multi_reduction <add>, %85, %cst_27 [2] : vector<2x8x8xf32> to vector<2x8xf32>
    %87 = vector.shape_cast %86 : vector<2x8xf32> to vector<2x8x1xf32>
    "tpu.trace_start"() <{level = 10 : i32, message = "bqk,bkd->bqd"}> : () -> ()
    %cst_28 = arith.constant dense<0.000000e+00> : vector<2x8x8xf32>
    %88 = tpu.matmul %85, %77, %cst_28 {dimension_numbers = #tpu.dot_dimension_numbers<[2], [1], [1], [2], [0, 0, 0, 1, 1, 2], [0], [0]>} : vector<2x8x8xf32>, vector<2x8x8xf32>, vector<2x8x8xf32> -> vector<2x8x8xf32>
    "tpu.trace_stop"() : () -> ()
    %89 = tpu.reciprocal %87 : vector<2x8x1xf32> -> vector<2x8x1xf32>
    %90 = vector.broadcast %89 : vector<2x8x1xf32> to vector<2x8x8xf32>
    %91 = arith.mulf %88, %90 : vector<2x8x8xf32>
    %92 = vector.shape_cast %91 : vector<2x8x8xf32> to vector<16x8xf32>
    %93 = tpu.concatenate %29, %50, %71, %92 in 1 : vector<16x8xf32>, vector<16x8xf32>, vector<16x8xf32>, vector<16x8xf32> -> vector<16x32xf32>
    %94 = arith.addf %0, %93 : vector<16x32xf32>
    %cst_29 = arith.constant dense<0.000000e+00> : vector<16xf32>
    %95 = vector.multi_reduction <add>, %94, %cst_29 [1] : vector<16x32xf32> to vector<16xf32>
    %96 = vector.shape_cast %95 : vector<16xf32> to vector<16x1xf32>
    %cst_30 = arith.constant 3.200000e+01 : f32
    %97 = vector.broadcast %cst_30 : f32 to vector<16x1xf32>
    %98 = arith.divf %96, %97 : vector<16x1xf32>
    %99 = vector.broadcast %98 : vector<16x1xf32> to vector<16x32xf32>
    %100 = arith.subf %94, %99 : vector<16x32xf32>
    %101 = arith.mulf %100, %100 : vector<16x32xf32>
    %cst_31 = arith.constant dense<0.000000e+00> : vector<16xf32>
    %102 = vector.multi_reduction <add>, %101, %cst_31 [1] : vector<16x32xf32> to vector<16xf32>
    %103 = vector.shape_cast %102 : vector<16xf32> to vector<16x1xf32>
    %cst_32 = arith.constant 3.200000e+01 : f32
    %104 = vector.broadcast %cst_32 : f32 to vector<16x1xf32>
    %105 = arith.divf %103, %104 : vector<16x1xf32>
    %106 = vector.broadcast %98 : vector<16x1xf32> to vector<16x32xf32>
    %107 = arith.subf %94, %106 : vector<16x32xf32>
    %cst_33 = arith.constant 9.99999974E-6 : f32
    %108 = vector.broadcast %cst_33 : f32 to vector<16x1xf32>
    %109 = arith.addf %105, %108 : vector<16x1xf32>
    %110 = math.rsqrt %109 : vector<16x1xf32>
    %111 = vector.broadcast %110 : vector<16x1xf32> to vector<16x32xf32>
    %112 = arith.mulf %107, %111 : vector<16x32xf32>
    %c0_34 = arith.constant 0 : index
    %c0_35 = arith.constant 0 : index
    %113 = vector.load %arg5[%c0_34, %c0_35] : memref<1x32xf32, #tpu.memory_space<vmem>>, vector<1x32xf32>
    %114 = vector.broadcast %113 : vector<1x32xf32> to vector<16x32xf32>
    %115 = arith.mulf %112, %114 : vector<16x32xf32>
    %c0_36 = arith.constant 0 : index
    %c0_37 = arith.constant 0 : index
    %116 = vector.load %arg6[%c0_36, %c0_37] : memref<1x32xf32, #tpu.memory_space<vmem>>, vector<1x32xf32>
    %117 = vector.broadcast %116 : vector<1x32xf32> to vector<16x32xf32>
    %118 = arith.addf %115, %117 : vector<16x32xf32>
    %c0_38 = arith.constant 0 : index
    %c0_39 = arith.constant 0 : index
    %119 = vector.load %arg7[%c0_38, %c0_39] : memref<16x32xf32, #tpu.memory_space<vmem>>, vector<16x32xf32>
    tpu.vector_store %arg7[%c0_38, %c0_39], %118 {strides = array<i32>} : memref<16x32xf32, #tpu.memory_space<vmem>>, vector<16x32xf32>,
    return
  }
  func.func @transform_0(%arg0: i32) -> (i32, i32) {
    %c0_i32 = arith.constant 0 : i32
    %c0_i32_0 = arith.constant 0 : i32
    return %arg0, %c0_i32 : i32, i32
  }
  func.func @transform_1(%arg0: i32) -> (i32, i32, i32) {
    %c0_i32 = arith.constant 0 : i32
    %c0_i32_0 = arith.constant 0 : i32
    %c0_i32_1 = arith.constant 0 : i32
    return %arg0, %c0_i32, %c0_i32_0 : i32, i32, i32
  }
  func.func @transform_2(%arg0: i32) -> (i32, i32) {
    %c0_i32 = arith.constant 0 : i32
    %c0_i32_0 = arith.constant 0 : i32
    %c0_i32_1 = arith.constant 0 : i32
    return %c0_i32, %c0_i32_0 : i32, i32
  }
  func.func @transform_3(%arg0: i32) -> (i32, i32) {
    %c0_i32 = arith.constant 0 : i32
    %c0_i32_0 = arith.constant 0 : i32
    %c0_i32_1 = arith.constant 0 : i32
    return %c0_i32, %c0_i32_0 : i32, i32
  }
  func.func @transform_4(%arg0: i32) -> (i32, i32) {
    %c0_i32 = arith.constant 0 : i32
    %c0_i32_0 = arith.constant 0 : i32
    %c0_i32_1 = arith.constant 0 : i32
    return %c0_i32, %c0_i32_0 : i32, i32
  }
  func.func @transform_5(%arg0: i32) -> (i32, i32) {
    %c0_i32 = arith.constant 0 : i32
    %c0_i32_0 = arith.constant 0 : i32
    %c0_i32_1 = arith.constant 0 : i32
    return %c0_i32, %c0_i32_0 : i32, i32
  }
  func.func @transform_6(%arg0: i32) -> (i32, i32) {
    %c0_i32 = arith.constant 0 : i32
    %c0_i32_0 = arith.constant 0 : i32
    return %arg0, %c0_i32 : i32, i32
  }
}

</mosaic_0001>

<bundles_post_ra>
// kernel: multi_head_attention.1
= control target key start
LH: loop header
LB: loop body
LE: loop exit
PB: predicated region body
PF: predicated region fallthrough
CT: control target
= control target key end

     0   :  { %11 = vsyncpa [#allocation3], 0  ;;  %s2177_s0 = inlined_call_operand.hbm [shape: f32[16,32], index: 0, kind: input, shape index: {}]   ;;  %s2178_s1 = inlined_call_operand.hbm [shape: f32[2,8,8], index: 1, kind: input, shape index: {}]   ;;  %s2179_s2 = inlined_call_operand.hbm [shape: f32[32,96], index: 2, kind: input, shape index: {}]   ;;  %s2180_s3 = inlined_call_operand.vmem [shape: f32[1,96], index: 3, kind: input, shape index: {}]   ;;  %s2181_s4 = inlined_call_operand.vmem [shape: f32[1,32], index: 4, kind: input, shape index: {}]   ;;  %s2182_s5 = inlined_call_operand.vmem [shape: f32[1,32], index: 5, kind: input, shape index: {}]   ;;  %s2183_s6 = inlined_call_operand.hbm [shape: f32[16,32], index: 6, kind: output, shape index: {}]  }
   0x1   :  { %12 = vsyncpa [#allocation6], 0 }
   0x2   :  { %13 = vsyncpa [#allocation4], 0  ;;  %s1891_s21 = smov [#allocation5]   ;;  %s1892_s23 = smov [#allocation2]  }
   0x3   :  { %s31_s22 = sshll.u32 %s1891_s21, 4  ;;  %s19_s24 = sshll.u32 %s1892_s23, 4  ;;  %s32_s22 = int_to_ptr.vmem [resolvable:$true] %s31_s22  ;;  %s20_s24 = int_to_ptr.vmem [resolvable:$true] %s19_s24 }
   0x4   :  { %s1813_s25 = scalar_lea.vmem %s32_s22, 256  ;;  %p1818_p1 = scmp.lt.s32.totalorder %s32_s22, %s32_s22 }
   0x5   :  { %p1814_p0 = scmp.ne.s32.totalorder %s32_s22, %s1813_s25  ;;  %p1819_p2 = scmp.lt.s32.totalorder %s1813_s25, %s1813_s25 }
   0x7   :  { %p1820_p3 = por %p1819_p2, %p1818_p1 }
   0x9   :  { %p1821_p4 = pnand %p1820_p3, %p1814_p0 }
   0xb   :  { %1824 = shalt.err (!%p1821_p4)
}
   0xc   :  { %s1893_s26 = smov 128   ;;  %s1894_s27 = smov 8  }
   0xd   :  { %37 = dma.hbm_to_vmem [thread:$0]  %s2178_s1, 256, %s32_s22, [#allocation6], %s1893_s26, %s1893_s26, %s1894_s27  }
   0xe   :  { %s1833_s30 = scalar_lea.vmem %s20_s24, 256  ;;  %p1838_p6 = scmp.lt.s32.totalorder %s20_s24, %s20_s24 }
   0xf   :  { %p1834_p5 = scmp.ne.s32.totalorder %s20_s24, %s1833_s30  ;;  %p1839_p7 = scmp.lt.s32.totalorder %s1833_s30, %s1833_s30 }
  0x11   :  { %p1840_p8 = por %p1839_p7, %p1838_p6 }
  0x13   :  { %p1841_p9 = pnand %p1840_p8, %p1834_p5 }
  0x15   :  { %1844 = shalt.err (!%p1841_p9)
}
  0x16   :  { %25 = dma.hbm_to_vmem [thread:$0]  %s2177_s0, 256, %s20_s24, [#allocation3], %s1893_s26, %s1893_s26, %s1894_s27  }
  0x17   :  { %s1895_s9 = smov [#allocation7]  }
  0x18   :  { %s43_s10 = sshll.u32 %s1895_s9, 4  ;;  %s44_s10 = int_to_ptr.vmem [resolvable:$true] %s43_s10 }
  0x19   :  { %s1853_s11 = scalar_lea.vmem %s44_s10, 512  ;;  %p1858_p11 = scmp.lt.s32.totalorder %s44_s10, %s44_s10 }
  0x1a   :  { %p1854_p10 = scmp.ne.s32.totalorder %s44_s10, %s1853_s11  ;;  %p1859_p12 = scmp.lt.s32.totalorder %s1853_s11, %s1853_s11 }
  0x1c   :  { %p1860_p13 = por %p1859_p12, %p1858_p11 }
  0x1e   :  { %p1861_p0 = pnand %p1860_p13, %p1854_p10 }
  0x20   :  { %1864 = shalt.err (!%p1861_p0)
}
  0x21   :  { %49 = dma.hbm_to_vmem [thread:$0]  %s2179_s2, 512, %s44_s10, [#allocation6], %s1893_s26, %s1893_s26, %s1894_s27  }
  0x22   :  { %1885 = dma.done.wait [#allocation3], 256  }
  0x23   :  { %1886 = vsyncadd [#allocation3], 4294967040 }
  0x24   :  { %1887 = dma.done.wait [#allocation6], 768  }
  0x25   :  { %1888 = vsyncadd [#allocation6], 4294966528  ;;  %vm78_vm0 = vcmask 261120   ;;  %v70_v0 = vld [vmem:[#allocation7 + $0x18] sm:$0xff]  ;;  %v69_v1 = vld [vmem:[#allocation7 + $0x10] sm:$0xff]  ;;  %v1896_v6 = vmov 0.0  }
  0x26   :  { %1657 = vmatprep.subr.mxu0 %v70_v0  ;;  %v1965_v2 = vld [vmem:[#allocation2] sm:$0xff]  ;;  %v68_v3 = vld [vmem:[#allocation7 + $0x8] sm:$0xff]  ;;  %1668 = vmatprep.subr.mxu1 %v1896_v6  ;;  %vm1897_vm1 = vmmov 0   ;;  %s1898_s13 = smov 96   ;;  %s1899_s14 = smov 64   ;;  %vm167_vm2 = vcmask 64512  }
  0x27   :  { %1658 = vmatpush3.msra.mxu0 %v70_v0  ;;  %1665 = vmatprep.mubr.msk.f32.mxu0 %vm78_vm0, %v1965_v2  ;;  %v67_v4 = vld [vmem:[#allocation7] sm:$0xff]  ;;  %v1969_v5 = vld [vmem:[#allocation2 + $0x8] sm:$0xff]  ;;  %s1900_s15 = smov 88   ;;  %s1902_s16 = smov 56   ;;  %v2009_v15 = vld [vmem:[#allocation5] sm:$0xff]  ;;  %vm1520_vm5 = vcmask 195584  }
  0x28   :  { %1659 = vmatprep.subr.mxu0 %v69_v1  ;;  %1670 = vmatprep.mubr.msk.f32.mxu1 %vm1897_vm1, %v1896_v6  ;;  %v1590_v8 = vld [vmem:[%s2180_s3] ss:$0 sm:$0xff]  ;;  %s1901_s3 = smov 120   ;;  %vm162_vm3 = vcmp.ne.f32.partialorder %v2009_v15, 0.0  ;;  %v2012_v16 = vld [vmem:[#allocation5 + $0x8] sm:$0xff]  ;;  %s1903_s17 = smov 80  }
  0x29   :  { %1660 = vmatpush3.msra.mxu0 %v69_v1  ;;  %vm163_vm4 = vcmp.ne.f32.partialorder %v2012_v16, 0.0  ;;  %s1904_s18 = smov 112   ;;  %s1905_s19 = smov 48   ;;  %vm1517_vm6 = vcmask 130048  }
  0x2a   :  { %1661 = vmatprep.subr.mxu0 %v68_v3  ;;  %s1906_s20 = smov 72   ;;  %s1907_s21 = smov 104  }
  0x2b   :  { %1662 = vmatpush3.msra.mxu0 %v68_v3  ;;  %s1908_s22 = smov 40   ;;  %s1909_s23 = smov 16  }
  0x2c   :  { %1663 = vmatprep.subr.mxu0 %v67_v4  ;;  %s1910_s24 = smov 24   ;;  %s1911_s7 = smov [#allocation8]  }
  0x2d   :  { %1664 = vmatpush3.msra.mxu0 %v67_v4  ;;  %s1577_s8 = sshll.u32 %s1911_s7, 4  ;;  %s1578_s8 = int_to_ptr.vmem [resolvable:$true] %s1577_s8 }
  0x2e   :  { %1666 = vmatmul.mubr.msk.f32.vlgmr.msra.gmra.mxu0 %vm78_vm0, %v1969_v5  ;;  %1678 = vmatprep.subr.mxu0 %v1896_v6  ;;  %s1865_s9 = scalar_lea.vmem %s1578_s8, 256  ;;  %p1870_p2 = scmp.lt.s32.totalorder %s1578_s8, %s1578_s8 }
  0x2f   :  { %1680 = vmatprep.mubr.msk.f32.mxu0 %vm1897_vm1, %v1896_v6  ;;  %p1866_p1 = scmp.ne.s32.totalorder %s1578_s8, %s1865_s9  ;;  %p1871_p3 = scmp.lt.s32.totalorder %s1865_s9, %s1865_s9 }
  0x31   :  { %p1872_p4 = por %p1871_p3, %p1870_p2 }
  0x33   :  { %p1873_p5 = pnand %p1872_p4, %p1866_p1 }
  0xee   :  { %v1667_v7 = vpop.f32.mrf.mxu0 }
  0xef   :  { %v1985_v11 = vadd.f32 %v1667_v7, %v1590_v8 }
  0xf0   :  { %v151_v9 = vpop.f32.mrf.mxu0 }
  0xf1   :  { %v1982_v10 = vadd.f32 %v1590_v8, %v151_v9 }
  0xf3   :  { %165 = vrot.lane.b32.xlu0 %v1982_v10, %s1898_s13 }
  0xf7   :  { %243 = vrot.lane.b32.xlu0 %v1985_v11, %s1898_s13 }
  0xfb   :  { %339 = vrot.lane.b32.xlu0 %v1982_v10, %s1899_s14 }
  0xff   :  { %497 = vrot.lane.b32.xlu0 %v1982_v10, %s1900_s15 }
 0x103   :  { %575 = vrot.lane.b32.xlu0 %v1985_v11, %s1900_s15 }
 0x107   :  { %495 = vrot.lane.b32.xlu0 %v1982_v10, %s1901_s3 }
 0x10b   :  { %573 = vrot.lane.b32.xlu0 %v1985_v11, %s1901_s3 }
 0x10f   :  { %671 = vrot.lane.b32.xlu0 %v1982_v10, %s1902_s16 }
 0x165   :  { %v166_v12 = vpop.permute.xlu0 %165 }
 0x166   :  { %1669 = vmatpush3.xpose.msk.msra.mxu1 %vm167_vm2, %v166_v12 }
 0x167   :  { %1673 = vmatprep.subr.mxu1 %v1896_v6 }
 0x169   :  { %1671 = vmatmul.mubr.msk.f32.vlgmr.msra.gmra.mxu1 %vm167_vm2, %v1982_v10  ;;  %v244_v13 = vpop.permute.xlu0 %243 }
 0x16a   :  { %1674 = vmatpush3.xpose.msk.msra.mxu1 %vm167_vm2, %v244_v13  ;;  %1675 = vmatprep.mubr.msk.f32.mxu1 %vm1897_vm1, %v1896_v6 }
 0x16b   :  { %1683 = vmatprep.subr.mxu1 %v1896_v6 }
 0x16d   :  { %1676 = vmatmul.mubr.msk.f32.vlgmr.msra.gmra.mxu1 %vm167_vm2, %v1985_v11  ;;  %v340_v14 = vpop.permute.xlu0 %339 }
 0x16e   :  { %1679 = vmatpush3.msra.mxu0 %v340_v14  ;;  %1685 = vmatprep.mubr.msk.f32.mxu1 %vm1897_vm1, %v1896_v6 }
 0x16f   :  { %1688 = vmatprep.subr.mxu0 %v1896_v6 }
 0x171   :  { %v498_v25 = vpop.permute.xlu0 %497 }
 0x175   :  { %v576_v30 = vpop.permute.xlu0 %575 }
 0x179   :  { %v496_v34 = vpop.permute.xlu0 %495 }
 0x17d   :  { %v574_v35 = vpop.permute.xlu0 %573 }
 0x181   :  { %v672_v38 = vpop.permute.xlu0 %671 }
 0x229   :  { %v238_v17 = vpop.f32.mrf.mxu1 }
 0x22a   :  { %v319_v18 = vsel %vm162_vm3, -1e+09, %v238_v17 }
 0x22b   :  { %v1672_v19 = vpop.f32.mrf.mxu1  ;;  %v321_v20 = vsel %vm167_vm2, %v319_v18, -inf }
 0x22c   :  { %322 = vmax.xlane.f32.xlu1 %v321_v20 }
 0x22d   :  { %v315_v21 = vpop.f32.mrf.mxu1 }
 0x22e   :  { %v320_v22 = vsel %vm163_vm4, -1e+09, %v315_v21 }
 0x22f   :  { %v1677_v23 = vpop.f32.mrf.mxu1  ;;  %v324_v24 = vsel %vm167_vm2, %v320_v22, -inf }
 0x230   :  { %325 = vmax.xlane.f32.xlu1 %v324_v24 }
 0x241   :  { %415 = vrot.lane.b32.xlu1 %v1985_v11, %s1899_s14 }
 0x245   :  { %747 = vrot.lane.b32.xlu1 %v1985_v11, %s1902_s16 }
 0x249   :  { %829 = vrot.lane.b32.xlu1 %v1982_v10, %s1903_s17 }
 0x2b5   :  { %v323_v26 = vpop.xlane.xlu1 %322 }
 0x2b6   :  { %v327_v27 = vsub.f32 %v319_v18, %v323_v26 }
 0x2b8   :  { %v329_v28 = vmul.f32 1.442695, %v327_v27 }
 0x2b9   :  { %v326_v29 = vpop.xlane.xlu1 %325 }
 0x2ba   :  { %1769 = vpow2.f32 %v329_v28  ;;  %v328_v31 = vsub.f32 %v320_v22, %v326_v29 }
 0x2bc   :  { %v331_v32 = vmul.f32 1.442695, %v328_v31 }
 0x2bd   :  { %v416_v33 = vpop.permute.xlu1 %415 }
 0x2be   :  { %1771 = vpow2.f32 %v331_v32  ;;  %1684 = vmatpush3.msra.mxu1 %v416_v33 }
 0x2bf   :  { %1693 = vmatprep.subr.mxu1 %v1896_v6 }
 0x2c1   :  { %v748_v39 = vpop.permute.xlu1 %747 }
 0x2c5   :  { %v830_v52 = vpop.permute.xlu1 %829 }
 0x2c7   :  { %v2028_v36 = vpop.eup %1769 }
 0x2c8   :  { %1681 = vmatmul.mubr.msk.f32.vlgmr.msra.gmra.mxu0 %vm167_vm2, %v2028_v36 }
 0x2c9   :  { %1689 = vmatpush3.xpose.msk.msra.mxu0 %vm167_vm2, %v498_v25  ;;  %1690 = vmatprep.mubr.msk.f32.mxu0 %vm1897_vm1, %v1896_v6 }
 0x2ca   :  { %1698 = vmatprep.subr.mxu0 %v1896_v6 }
 0x2cb   :  { %v2036_v37 = vpop.eup %1771 }
 0x2cc   :  { %1686 = vmatmul.mubr.msk.f32.vlgmr.msra.gmra.mxu1 %vm167_vm2, %v2036_v37  ;;  %1691 = vmatmul.mubr.msk.f32.vlgmr.msra.gmra.mxu0 %vm167_vm2, %v496_v34 }
 0x2cd   :  { %1694 = vmatpush3.xpose.msk.msra.mxu1 %vm167_vm2, %v576_v30  ;;  %1699 = vmatpush3.msra.mxu0 %v672_v38 }
 0x2ce   :  { %1695 = vmatprep.mubr.msk.f32.mxu1 %vm1897_vm1, %v1896_v6  ;;  %1703 = vmatprep.subr.mxu1 %v1896_v6 }
 0x2cf   :  { %1700 = vmatprep.mubr.msk.f32.mxu0 %vm1897_vm1, %v1896_v6  ;;  %1708 = vmatprep.subr.mxu0 %v1896_v6 }
 0x2d0   :  { %1696 = vmatmul.mubr.msk.f32.vlgmr.msra.gmra.mxu1 %vm167_vm2, %v574_v35 }
 0x2d1   :  { %1704 = vmatpush3.msra.mxu1 %v748_v39  ;;  %1705 = vmatprep.mubr.msk.f32.mxu1 %vm1897_vm1, %v1896_v6 }
 0x2d2   :  { %1713 = vmatprep.subr.mxu1 %v1896_v6 }
 0x388   :  { %v2052_v40 = vpop.f32.mrf.mxu0 }
 0x38a   :  { %v1682_v41 = vpop.f32.mrf.mxu0 }
 0x38c   :  { %v2054_v42 = vpop.f32.mrf.mxu1  ;;  %v569_v43 = vpop.f32.mrf.mxu0 }
 0x38d   :  { %v651_v44 = vsel %vm162_vm3, -1e+09, %v569_v43 }
 0x38e   :  { %v1687_v45 = vpop.f32.mrf.mxu1  ;;  %v1692_v46 = vpop.f32.mrf.mxu0  ;;  %v653_v47 = vsel %vm167_vm2, %v651_v44, -inf }
 0x38f   :  { %654 = vmax.xlane.f32.xlu1 %v653_v47 }
 0x390   :  { %v647_v48 = vpop.f32.mrf.mxu1 }
 0x391   :  { %v652_v49 = vsel %vm163_vm4, -1e+09, %v647_v48 }
 0x392   :  { %v1697_v50 = vpop.f32.mrf.mxu1  ;;  %v656_v51 = vsel %vm167_vm2, %v652_v49, -inf }
 0x393   :  { %657 = vmax.xlane.f32.xlu0 %v656_v51 }
 0x3a0   :  { %827 = vrot.lane.b32.xlu1 %v1982_v10, %s1904_s18 }
 0x3a4   :  { %1079 = vrot.lane.b32.xlu1 %v1985_v11, %s1905_s19 }
 0x3a8   :  { %1161 = vrot.lane.b32.xlu1 %v1982_v10, %s1906_s20 }
 0x3a9   :  { %907 = vrot.lane.b32.xlu0 %v1985_v11, %s1903_s17 }
 0x3ad   :  { %905 = vrot.lane.b32.xlu0 %v1985_v11, %s1904_s18 }
 0x3b1   :  { %1003 = vrot.lane.b32.xlu0 %v1982_v10, %s1905_s19 }
 0x418   :  { %v655_v53 = vpop.xlane.xlu1 %654 }
 0x419   :  { %v659_v54 = vsub.f32 %v651_v44, %v655_v53 }
 0x41b   :  { %v661_v55 = vmul.f32 1.442695, %v659_v54 }
 0x41c   :  { %v658_v56 = vpop.xlane.xlu0 %657  ;;  %v828_v62 = vpop.permute.xlu1 %827 }
 0x41d   :  { %1773 = vpow2.f32 %v661_v55  ;;  %v660_v57 = vsub.f32 %v652_v49, %v658_v56 }
 0x41f   :  { %v663_v58 = vmul.f32 1.442695, %v660_v57 }
 0x420   :  { %v908_v59 = vpop.permute.xlu0 %907  ;;  %v1080_v1 = vpop.permute.xlu1 %1079 }
 0x421   :  { %1775 = vpow2.f32 %v663_v58 }
 0x424   :  { %v906_v60 = vpop.permute.xlu0 %905  ;;  %v1162_v21 = vpop.permute.xlu1 %1161 }
 0x428   :  { %v1004_v0 = vpop.permute.xlu0 %1003 }
 0x42a   :  { %v2070_v61 = vpop.eup %1773 }
 0x42b   :  { %1701 = vmatmul.mubr.msk.f32.vlgmr.msra.gmra.mxu0 %vm167_vm2, %v2070_v61  ;;  %v665_v15 = vsel %vm167_vm2, %v2070_v61, 0.0  ;;  %v336_v61 = vsel %vm167_vm2, %v2036_v37, 0.0 }
 0x42c   :  { %1709 = vmatpush3.xpose.msk.msra.mxu0 %vm167_vm2, %v830_v52  ;;  %1710 = vmatprep.mubr.msk.f32.mxu0 %vm1897_vm1, %v1896_v6 }
 0x42d   :  { %1718 = vmatprep.subr.mxu0 %v1896_v6 }
 0x42e   :  { %v2078_v63 = vpop.eup %1775 }
 0x42f   :  { %1706 = vmatmul.mubr.msk.f32.vlgmr.msra.gmra.mxu1 %vm167_vm2, %v2078_v63  ;;  %1711 = vmatmul.mubr.msk.f32.vlgmr.msra.gmra.mxu0 %vm167_vm2, %v828_v62  ;;  %v668_v49 = vsel %vm167_vm2, %v2078_v63, 0.0 }
 0x430   :  { %1714 = vmatpush3.xpose.msk.msra.mxu1 %vm167_vm2, %v908_v59  ;;  %1719 = vmatpush3.msra.mxu0 %v1004_v0  ;;  %v333_v59 = vsel %vm167_vm2, %v2028_v36, 0.0 }
 0x431   :  { %1715 = vmatprep.mubr.msk.f32.mxu1 %vm1897_vm1, %v1896_v6  ;;  %1723 = vmatprep.subr.mxu1 %v1896_v6 }
 0x432   :  { %1720 = vmatprep.mubr.msk.f32.mxu0 %vm1897_vm1, %v1896_v6  ;;  %1728 = vmatprep.subr.mxu0 %v1896_v6 }
 0x433   :  { %1716 = vmatmul.mubr.msk.f32.vlgmr.msra.gmra.mxu1 %vm167_vm2, %v906_v60 }
 0x434   :  { %1724 = vmatpush3.msra.mxu1 %v1080_v1  ;;  %1725 = vmatprep.mubr.msk.f32.mxu1 %vm1897_vm1, %v1896_v6 }
 0x435   :  { %1733 = vmatprep.subr.mxu1 %v1896_v6 }
 0x4eb   :  { %v2094_v3 = vpop.f32.mrf.mxu0 }
 0x4ed   :  { %v1702_v4 = vpop.f32.mrf.mxu0 }
 0x4ef   :  { %v2096_v7 = vpop.f32.mrf.mxu1  ;;  %v901_v8 = vpop.f32.mrf.mxu0 }
 0x4f0   :  { %v983_v9 = vsel %vm162_vm3, -1e+09, %v901_v8 }
 0x4f1   :  { %v1707_v12 = vpop.f32.mrf.mxu1  ;;  %v1712_v13 = vpop.f32.mrf.mxu0  ;;  %v985_v14 = vsel %vm167_vm2, %v983_v9, -inf }
 0x4f2   :  { %986 = vmax.xlane.f32.xlu1 %v985_v14 }
 0x4f3   :  { %v979_v17 = vpop.f32.mrf.mxu1 }
 0x4f4   :  { %v984_v18 = vsel %vm163_vm4, -1e+09, %v979_v17 }
 0x4f5   :  { %v1717_v19 = vpop.f32.mrf.mxu1  ;;  %v988_v20 = vsel %vm167_vm2, %v984_v18, -inf }
 0x4f6   :  { %989 = vmax.xlane.f32.xlu0 %v988_v20 }
 0x503   :  { %1159 = vrot.lane.b32.xlu1 %v1982_v10, %s1907_s21 }
 0x50c   :  { %1239 = vrot.lane.b32.xlu0 %v1985_v11, %s1906_s20 }
 0x510   :  { %1237 = vrot.lane.b32.xlu0 %v1985_v11, %s1907_s21 }
 0x57b   :  { %v987_v22 = vpop.xlane.xlu1 %986 }
 0x57c   :  { %v991_v23 = vsub.f32 %v983_v9, %v987_v22 }
 0x57e   :  { %v993_v24 = vmul.f32 1.442695, %v991_v23 }
 0x57f   :  { %v990_v25 = vpop.xlane.xlu0 %989  ;;  %v1160_v31 = vpop.permute.xlu1 %1159 }
 0x580   :  { %1777 = vpow2.f32 %v993_v24  ;;  %v992_v26 = vsub.f32 %v984_v18, %v990_v25 }
 0x582   :  { %v995_v27 = vmul.f32 1.442695, %v992_v26 }
 0x583   :  { %v1240_v29 = vpop.permute.xlu0 %1239 }
 0x584   :  { %1779 = vpow2.f32 %v995_v27 }
 0x587   :  { %v1238_v32 = vpop.permute.xlu0 %1237 }
 0x58d   :  { %v1778_v28 = vpop.eup %1777 }
 0x58e   :  { %1721 = vmatmul.mubr.msk.f32.vlgmr.msra.gmra.mxu0 %vm167_vm2, %v1778_v28  ;;  %v997_v16 = vsel %vm167_vm2, %v1778_v28, 0.0 }
 0x58f   :  { %1729 = vmatpush3.xpose.msk.msra.mxu0 %vm167_vm2, %v1162_v21  ;;  %1730 = vmatprep.mubr.msk.f32.mxu0 %vm1897_vm1, %v1896_v6 }
 0x590   :  { %1738 = vmatprep.subr.mxu0 %v1896_v6 }
 0x591   :  { %v1780_v30 = vpop.eup %1779 }
 0x592   :  { %1726 = vmatmul.mubr.msk.f32.vlgmr.msra.gmra.mxu1 %vm167_vm2, %v1780_v30  ;;  %1731 = vmatmul.mubr.msk.f32.vlgmr.msra.gmra.mxu0 %vm167_vm2, %v1160_v31  ;;  %v1000_v48 = vsel %vm167_vm2, %v1780_v30, 0.0 }
 0x593   :  { %1734 = vmatpush3.xpose.msk.msra.mxu1 %vm167_vm2, %v1240_v29  ;;  %1735 = vmatprep.mubr.msk.f32.mxu1 %vm1897_vm1, %v1896_v6 }
 0x594   :  { %1743 = vmatprep.subr.mxu1 %v1896_v6  ;;  %1740 = vmatprep.mubr.msk.f32.mxu0 %vm1897_vm1, %v1896_v6 }
 0x596   :  { %1736 = vmatmul.mubr.msk.f32.vlgmr.msra.gmra.mxu1 %vm167_vm2, %v1238_v32 }
 0x597   :  { %1745 = vmatprep.mubr.msk.f32.mxu1 %vm1897_vm1, %v1896_v6 }
 0x64e   :  { %v2124_v33 = vpop.f32.mrf.mxu0 }
 0x650   :  { %v1722_v34 = vpop.f32.mrf.mxu0 }
 0x652   :  { %v1151_v35 = vpop.f32.mrf.mxu1  ;;  %v1233_v38 = vpop.f32.mrf.mxu0 }
 0x653   :  { %v1315_v39 = vsel %vm162_vm3, -1e+09, %v1233_v38 }
 0x654   :  { %v1727_v41 = vpop.f32.mrf.mxu1  ;;  %v1732_v43 = vpop.f32.mrf.mxu0  ;;  %v1317_v44 = vsel %vm167_vm2, %v1315_v39, -inf }
 0x655   :  { %1318 = vmax.xlane.f32.xlu1 %v1317_v44 }
 0x656   :  { %v1311_v45 = vpop.f32.mrf.mxu1 }
 0x657   :  { %v1316_v46 = vsel %vm163_vm4, -1e+09, %v1311_v45 }
 0x658   :  { %v1737_v47 = vpop.f32.mrf.mxu1  ;;  %v1320_v6 = vsel %vm167_vm2, %v1316_v46, -inf }
 0x659   :  { %1321 = vmax.xlane.f32.xlu0 %v1320_v6 }
 0x666   :  { %1411 = vrot.lane.b32.xlu1 %v1985_v11, %s1908_s22 }
 0x66f   :  { %1335 = vrot.lane.b32.xlu0 %v1982_v10, %s1908_s22 }
 0x68a   :  { %666 = vadd.xlane.f32.xlu1 %v665_v15 }
 0x68e   :  { %1001 = vadd.xlane.f32.xlu1 %v1000_v48  ;;  %669 = vadd.xlane.f32.xlu0 %v668_v49 }
 0x692   :  { %998 = vadd.xlane.f32.xlu0 %v997_v16 }
 0x6de   :  { %v1319_v50 = vpop.xlane.xlu1 %1318 }
 0x6df   :  { %v1323_v51 = vsub.f32 %v1315_v39, %v1319_v50 }
 0x6e1   :  { %v1325_v52 = vmul.f32 1.442695, %v1323_v51 }
 0x6e2   :  { %v1412_v11 = vpop.permute.xlu1 %1411  ;;  %v1322_v53 = vpop.xlane.xlu0 %1321 }
 0x6e3   :  { %1781 = vpow2.f32 %v1325_v52  ;;  %v1324_v10 = vsub.f32 %v1316_v46, %v1322_v53  ;;  %1744 = vmatpush3.msra.mxu1 %v1412_v11 }
 0x6e5   :  { %v1327_v54 = vmul.f32 1.442695, %v1324_v10 }
 0x6e6   :  { %v1336_v55 = vpop.permute.xlu0 %1335 }
 0x6e7   :  { %1783 = vpow2.f32 %v1327_v54  ;;  %1739 = vmatpush3.msra.mxu0 %v1336_v55 }
 0x6f0   :  { %v1782_v56 = vpop.eup %1781 }
 0x6f1   :  { %1741 = vmatmul.mubr.msk.f32.vlgmr.msra.gmra.mxu0 %vm167_vm2, %v1782_v56  ;;  %v1329_v57 = vsel %vm167_vm2, %v1782_v56, 0.0 }
 0x6f2   :  { %1330 = vadd.xlane.f32.xlu0 %v1329_v57 }
 0x6f4   :  { %v1784_v58 = vpop.eup %1783 }
 0x6f5   :  { %1746 = vmatmul.mubr.msk.f32.vlgmr.msra.gmra.mxu1 %vm167_vm2, %v1784_v58  ;;  %v1332_v60 = vsel %vm167_vm2, %v1784_v58, 0.0 }
 0x6f6   :  { %334 = vadd.xlane.f32.xlu0 %v333_v59  ;;  %1333 = vadd.xlane.f32.xlu1 %v1332_v60  ;;  %v1617_v59 = vld [vmem:[%s2181_s4] ss:$0 sm:$0xff] }
 0x6fa   :  { %337 = vadd.xlane.f32.xlu1 %v336_v61  ;;  %v1618_v61 = vld [vmem:[%s2182_s5] ss:$0 sm:$0xff] }
 0x713   :  { %v667_v62 = vpop.xlane.xlu1 %666 }
 0x714   :  { %1785 = vrcp.f32 %v667_v62 }
 0x717   :  { %v1002_v63 = vpop.xlane.xlu1 %1001  ;;  %v670_v0 = vpop.xlane.xlu0 %669 }
 0x718   :  { %1787 = vrcp.f32 %v1002_v63 }
 0x719   :  { %1789 = vrcp.f32 %v670_v0 }
 0x71b   :  { %v999_v1 = vpop.xlane.xlu0 %998 }
 0x71c   :  { %1791 = vrcp.f32 %v999_v1 }
 0x721   :  { %v1786_v4 = vpop.eup %1785 }
 0x722   :  { %v825_v8 = vmul.f32 %v1786_v4, %v2094_v3 }
 0x724   :  { %1493 = vrot.lane.b32.xlu0 %v825_v8, %s1894_s27 }
 0x725   :  { %v1788_v36 = vpop.eup %1787 }
 0x726   :  { %v1790_v9 = vpop.eup %1789  ;;  %v1158_v12 = vmul.f32 %v1788_v36, %v1151_v35 }
 0x727   :  { %v826_v13 = vmul.f32 %v1790_v9, %v2096_v7 }
 0x728   :  { %1503 = vrot.lane.b32.xlu0 %v1158_v12, %s1909_s23 }
 0x729   :  { %v1792_v37 = vpop.eup %1791  ;;  %1495 = vrot.lane.b32.xlu1 %v826_v13, %s1894_s27 }
 0x72a   :  { %v1157_v14 = vmul.f32 %v1792_v37, %v2124_v33 }
 0x72d   :  { %1501 = vrot.lane.b32.xlu1 %v1157_v14, %s1909_s23 }
 0x77b   :  { %v1331_v17 = vpop.xlane.xlu0 %1330 }
 0x77c   :  { %1793 = vrcp.f32 %v1331_v17 }
 0x77f   :  { %v1334_v18 = vpop.xlane.xlu1 %1333  ;;  %v335_v25 = vpop.xlane.xlu0 %334 }
 0x780   :  { %1795 = vrcp.f32 %v1334_v18 }
 0x781   :  { %1797 = vrcp.f32 %v335_v25 }
 0x783   :  { %v338_v26 = vpop.xlane.xlu1 %337 }
 0x784   :  { %1799 = vrcp.f32 %v338_v26 }
 0x789   :  { %v1794_v3 = vpop.eup %1793 }
 0x78d   :  { %v1796_v22 = vpop.eup %1795 }
 0x78e   :  { %v1798_v28 = vpop.eup %1797 }
 0x78f   :  { %v493_v32 = vmul.f32 %v1798_v28, %v2052_v40 }
 0x791   :  { %v1800_v30 = vpop.eup %1799 }
 0x792   :  { %v494_v34 = vmul.f32 %v1800_v30, %v2054_v42 }
 0x796   :  { %v1494_v29 = vpop.permute.xlu0 %1493 }
 0x797   :  { %v1515_v33 = vsel %vm167_vm2, %v493_v32, %v1494_v29 }
 0x79a   :  { %v1504_v35 = vpop.permute.xlu0 %1503 }
 0x79b   :  { %v1496_v27 = vpop.permute.xlu1 %1495 }
 0x79c   :  { %v1516_v41 = vsel %vm167_vm2, %v494_v34, %v1496_v27 }
 0x79d   :  { %v1519_v45 = vsel %vm1517_vm6, %v1516_v41, %v1504_v35 }
 0x79f   :  { %v1502_v31 = vpop.permute.xlu1 %1501 }
 0x7a0   :  { %v1518_v38 = vsel %vm1517_vm6, %v1515_v33, %v1502_v31 }
 0x7b1   :  { %v1407_v19 = vpop.f32.mrf.mxu0 }
 0x7b2   :  { %v1489_v20 = vmul.f32 %v1794_v3, %v1407_v19 }
 0x7b3   :  { %v1742_v21 = vpop.f32.mrf.mxu0 }
 0x7b4   :  { %1509 = vrot.lane.b32.xlu1 %v1489_v20, %s1910_s24 }
 0x7b5   :  { %v1483_v7 = vpop.f32.mrf.mxu1 }
 0x7b6   :  { %v1490_v23 = vmul.f32 %v1796_v22, %v1483_v7 }
 0x7b7   :  { %v1747_v24 = vpop.f32.mrf.mxu1 }
 0x7b8   :  { %1511 = vrot.lane.b32.xlu0 %v1490_v23, %s1910_s24 }
 0x826   :  { %v1510_v39 = vpop.permute.xlu1 %1509 }
 0x827   :  { %v1521_v43 = vsel %vm1520_vm5, %v1518_v38, %v1510_v39 }
 0x828   :  { %v1523_v44 = vadd.f32 %v1521_v43, %v1965_v2 }
 0x82a   :  { %v1512_v46 = vpop.permute.xlu0 %1511  ;;  %v1525_v47 = vsel %vm78_vm0, %v1523_v44, 0.0 }
 0x82b   :  { %v1522_v6 = vsel %vm1520_vm5, %v1519_v45, %v1512_v46  ;;  %1526 = vadd.xlane.f32.xlu1 %v1525_v47 }
 0x82c   :  { %v1524_v40 = vadd.f32 %v1522_v6, %v1969_v5 }
 0x82e   :  { %v1528_v15 = vsel %vm78_vm0, %v1524_v40, 0.0 }
 0x82f   :  { %1529 = vadd.xlane.f32.xlu0 %v1528_v15 }
 0x8b4   :  { %v1527_v42 = vpop.xlane.xlu1 %1526 }
 0x8b5   :  { %v1532_v48 = vmul.f32 0.03125, %v1527_v42 }
 0x8b7   :  { %v1534_v49 = vsub.f32 %v1523_v44, %v1532_v48 }
 0x8b8   :  { %v1530_v16 = vpop.xlane.xlu0 %1529 }
 0x8b9   :  { %v1533_v50 = vmul.f32 0.03125, %v1530_v16  ;;  %v1536_v51 = vmul.f32 %v1534_v49, %v1534_v49 }
 0x8bb   :  { %v1535_v52 = vsub.f32 %v1524_v40, %v1533_v50  ;;  %v1538_v2 = vsel %vm78_vm0, %v1536_v51, 0.0 }
 0x8bc   :  { %1539 = vadd.xlane.f32.xlu0 %v1538_v2 }
 0x8bd   :  { %v1537_v11 = vmul.f32 %v1535_v52, %v1535_v52 }
 0x8bf   :  { %v1541_v53 = vsel %vm78_vm0, %v1537_v11, 0.0 }
 0x8c0   :  { %1542 = vadd.xlane.f32.xlu1 %v1541_v53 }
 0x945   :  { %v1540_v10 = vpop.xlane.xlu0 %1539 }
 0x946   :  { %v1544_v54 = vmul.f32 0.03125, %v1540_v10 }
 0x948   :  { %v1546_v5 = vadd.f32 1e-05, %v1544_v54 }
 0x949   :  { %v1543_v55 = vpop.xlane.xlu1 %1542 }
 0x94a   :  { %1801 = vrsqrt.f32 %v1546_v5  ;;  %v1545_v56 = vmul.f32 0.03125, %v1543_v55 }
 0x94c   :  { %v1547_v57 = vadd.f32 1e-05, %v1545_v56 }
 0x94e   :  { %1803 = vrsqrt.f32 %v1547_v57 }
 0x957   :  { %v1802_v58 = vpop.eup %1801 }
 0x958   :  { %v1550_v60 = vmul.f32 %v1802_v58, %v1534_v49 }
 0x95a   :  { %v1559_v62 = vmul.f32 %v1617_v59, %v1550_v60 }
 0x95b   :  { %v1804_v63 = vpop.eup %1803 }
 0x95c   :  { %v1551_v0 = vmul.f32 %v1804_v63, %v1535_v52  ;;  %v1568_v1 = vadd.f32 %v1618_v61, %v1559_v62 }
 0x95e   :  { %v1560_v4 = vmul.f32 %v1617_v59, %v1551_v0  ;;  %1570 = vst.msk [vmem:[#allocation8] sm:$0xff] %vm78_vm0, %v1568_v1 }
 0x960   :  { %v1569_v8 = vadd.f32 %v1618_v61, %v1560_v4 }
 0x962   :  { %1571 = vst.msk [vmem:[#allocation8 + $0x8] sm:$0xff] %vm78_vm0, %v1569_v8 }
 0x963   :  { %1876 = shalt.err (!%p1873_p5)
}
 0x964   :  { %1583 = dma.vmem_to_hbm [thread:$0]  %s1578_s8, 256, %s2183_s6, [#allocation4], %s1893_s26, %s1893_s26, %s1894_s27  }
 0x965   :  { %1889 = dma.done.wait [#allocation4], 256  }
 0x966   :  { %1890 = vsyncadd [#allocation4], 4294967040 }
 0x967   :  { %1587 = vsyncpa [#allocation3], 1 }
 0x968   :  { %1588 = vsyncpa [#allocation6], 1 }
 0x969   :  { %1589 = vsyncpa [#allocation4], 1 }

</bundles_post_ra>
